<compile_context>
chip_gen: v6e
topology: v6e:2x2x1
jax: 0.10.0
libtpu: 0.0.40
codegen_flags: <defaults>
</compile_context>

<pallas_src>
import functools

import jax
import jax.numpy as jnp
from jax.experimental import pallas as pl
from jax.experimental.pallas import tpu as pltpu


# ---------------------------------------------------------------------------
# Filterbank construction (plain JAX glue; torchaudio F.create_fb_matrix,
# htk scale, norm=None).  Depends only on static shapes/params.
# ---------------------------------------------------------------------------
def _hz_to_mel_htk(f):
    return 2595.0 * jnp.log10(1.0 + f / 700.0)


def _mel_to_hz_htk(m):
    return 700.0 * (10.0 ** (m / 2595.0) - 1.0)


def create_fb_matrix(n_freqs: int, f_min: float, f_max: float,
                     n_mels: int, sample_rate: int) -> jnp.ndarray:
    all_freqs = jnp.linspace(0.0, sample_rate // 2, n_freqs, dtype=jnp.float32)
    m_min = _hz_to_mel_htk(jnp.asarray(f_min, jnp.float32))
    m_max = _hz_to_mel_htk(jnp.asarray(f_max, jnp.float32))
    m_pts = jnp.linspace(m_min, m_max, n_mels + 2, dtype=jnp.float32)
    f_pts = _mel_to_hz_htk(m_pts)                          # (n_mels + 2,)
    f_diff = f_pts[1:] - f_pts[:-1]                        # (n_mels + 1,)
    slopes = f_pts[None, :] - all_freqs[:, None]           # (n_freqs, n_mels + 2)
    down_slopes = -slopes[:, :-2] / f_diff[:-1]            # (n_freqs, n_mels)
    up_slopes = slopes[:, 2:] / f_diff[1:]                 # (n_freqs, n_mels)
    fb = jnp.maximum(0.0, jnp.minimum(down_slopes, up_slopes))
    return fb                                              # (n_freqs, n_mels)


# ---------------------------------------------------------------------------
# Pallas kernel: one (batch-block, time-tile) block.
#   out[b] = fb^T @ spec[b]   for each of the Bb batch elements in the block.
# Bb is a static Python int, so the loop unrolls into Bb independent MXU
# matmuls; each result is stored immediately, keeping live ranges short.
# ---------------------------------------------------------------------------
def _melscale_kernel(fbt_ref, spec_ref, out_ref):
    # fbt_ref:  (n_mels, n_freqs)   -- constant across the whole grid
    # spec_ref: (Bb, n_freqs, tt)   -- Bb batch elements, one time tile
    # out_ref:  (Bb, n_mels, tt)
    fbt = fbt_ref[...]                                      # hoisted, loaded once
    for b in range(spec_ref.shape[0]):
        out_ref[b] = jnp.dot(fbt, spec_ref[b],
                             preferred_element_type=jnp.float32
                             ).astype(out_ref.dtype)


@functools.partial(
    jax.jit,
    static_argnames=("n_mels", "sample_rate", "f_min", "f_max",
                     "target_block_bytes", "max_batch_block"))
def mel_scale(specgram: jnp.ndarray,
              n_mels: int = 128,
              sample_rate: int = 16000,
              f_min: float = 0.0,
              f_max: float | None = None,
              target_block_bytes: int = 4 * 1024 * 1024,
              max_batch_block: int = 16) -> jnp.ndarray:
    """MelScale.forward for specgram of shape (..., n_freqs, time)."""
    if f_max is None:
        f_max = float(sample_rate // 2)
    assert f_min <= f_max, f"Require f_min: {f_min} <= f_max: {f_max}"

    shape = specgram.shape
    n_freqs, time = shape[-2], shape[-1]
    spec3 = specgram.reshape(-1, n_freqs, time)             # (B, F, T)
    B = spec3.shape[0]

    fb = create_fb_matrix(n_freqs, f_min, f_max, n_mels, sample_rate)
    # Matches torch `fb.type_as(specgram)`: bf16 inputs use a bf16 filterbank
    # (small deltas vs an all-f32 reference are expected for bf16 inputs);
    # accumulation stays f32 inside the kernel.
    fbt = fb.T.astype(specgram.dtype)                       # (n_mels, n_freqs)

    itemsize = jnp.dtype(specgram.dtype).itemsize

    # ---- Block sizing by bytes (amortize the ~0.35 us/grid-step overhead) ----
    # 128-aligned time-tile budget from the byte target (f32@F~513 -> tt=2048,
    # bf16 -> tt=4096).
    tt_budget = max(
        128, int(round(target_block_bytes / (n_freqs * itemsize) / 128)) * 128)

    if time <= tt_budget:
        # Whole time axis in one tile: pack Bb batch elements per grid step.
        tt = time
        bb = max(1, target_block_bytes // (n_freqs * max(time, 1) * itemsize))
        bb = int(min(bb, max_batch_block, B))
        while B % bb != 0:        # keep blocks exactly covering B (no raggedness
            bb -= 1               # on the leading axis); worst case bb=1.
    else:
        # Long clip: tile time, one batch element per step (time tiles dominate).
        tt = tt_budget
        bb = 1

    nB = B // bb
    nT = pl.cdiv(time, tt)

    # Put the largest trip-count axis first so v7x megacore sharding of the
    # leading "parallel" axis actually splits useful work across both cores.
    if nT >= nB:
        grid = (nT, nB)
        fb_idx = lambda t, b: (0, 0)
        blk_idx = lambda t, b: (b, 0, t)
    else:
        grid = (nB, nT)
        fb_idx = lambda b, t: (0, 0)
        blk_idx = lambda b, t: (b, 0, t)

    cost = pl.CostEstimate(
        flops=2 * B * n_mels * n_freqs * time,
        transcendentals=0,
        bytes_accessed=(B * n_freqs * time + B * n_mels * time
                        + n_mels * n_freqs) * itemsize,
    )

    # Explicit scoped-VMEM budget: >= 32 MiB so large blocks compile on v5e
    # (16 MiB default scoped limit), capped at 64 MiB for v7x physical VMEM.
    block_bytes = (bb * n_freqs * tt + bb * n_mels * tt
                   + n_mels * n_freqs) * itemsize
    vmem_limit = int(min(64 * 1024 * 1024,
                         max(32 * 1024 * 1024, 3 * block_bytes)))

    out = pl.pallas_call(
        _melscale_kernel,
        out_shape=jax.ShapeDtypeStruct((B, n_mels, time), specgram.dtype),
        grid_spec=pltpu.PrefetchScalarGridSpec(
            num_scalar_prefetch=0,
            grid=grid,
            in_specs=[
                # constant filterbank, same block for every grid step
                pl.BlockSpec((n_mels, n_freqs), fb_idx),
                # Bb batch elements, one time tile (full-dim or 128-aligned)
                pl.BlockSpec((bb, n_freqs, tt), blk_idx),
            ],
            out_specs=pl.BlockSpec((bb, n_mels, tt), blk_idx),
        ),
        compiler_params=pltpu.CompilerParams(
            # No reduction grid axis -> every grid point independent; lets v7x
            # shard the leading (largest) axis across both TensorCores.
            dimension_semantics=("parallel", "parallel"),
            vmem_limit_bytes=vmem_limit),
        cost_estimate=cost,
    )(fbt, spec3)

    return out.reshape(shape[:-2] + (n_mels, time))


if __name__ == "__main__":
    key = jax.random.PRNGKey(0)
    k0, k1 = jax.random.split(key)

    # Small shapes consistent with the module: batch=2, channels=4,
    # n_freqs=65 (n_fft=128), time=16, n_mels=32.
    batch, channels, n_freqs, time = 2, 4, 65, 16
    n_mels, sample_rate = 32, 16000

    fb = create_fb_matrix(n_freqs, 0.0, float(sample_rate // 2), n_mels, sample_rate)

    # 1) Short-time / many-batch path: whole time axis per block, Bb=8 batch
    #    elements packed into a single grid step (no wrapper transposes).
    x = jax.random.uniform(k0, (batch, channels, n_freqs, time), dtype=jnp.float32)
    y = jax.block_until_ready(mel_scale(x, n_mels=n_mels, sample_rate=sample_rate))
    ref = jnp.einsum("bcft,fm->bcmt", x, fb)
    assert y.shape == (batch, channels, n_mels, time)
    assert jnp.allclose(y, ref, atol=1e-4, rtol=1e-4)

    # 2) Time-tiled path with a ragged tail: shrink the block-byte budget so
    #    tt=256 and T=640 -> 3 time tiles (last one half-masked).
    x2 = jax.random.uniform(k1, (1, n_freqs, 640), dtype=jnp.float32)
    y2 = jax.block_until_ready(
        mel_scale(x2, n_mels=n_mels, sample_rate=sample_rate,
                  target_block_bytes=64 * 1024))
    ref2 = jnp.einsum("bft,fm->bmt", x2, fb)
    assert y2.shape == (1, n_mels, 640)
    assert jnp.allclose(y2, ref2, atol=1e-4, rtol=1e-4)

    # 3) Same input through the default (single large block) path.
    y3 = jax.block_until_ready(mel_scale(x2, n_mels=n_mels, sample_rate=sample_rate))
    assert jnp.allclose(y3, ref2, atol=1e-4, rtol=1e-4)

    print("KERNEL_OK")
</pallas_src>

<mosaic_0001>
module attributes {stable_mosaic.version = 11 : i64} {
  func.func @_melscale_kernel(%arg0: i32, %arg1: i32, %arg2: memref<32x65xf32, #tpu.memory_space<vmem>>, %arg3: memref<8x65x16xf32, #tpu.memory_space<vmem>>, %arg4: memref<8x32x16xf32, #tpu.memory_space<vmem>>) attributes {dimension_semantics = [#tpu.dimension_semantics<parallel>, #tpu.dimension_semantics<parallel>], iteration_bounds = array<i64: 1, 1>, scalar_prefetch = 0 : i64, scratch_operands = 0 : i64, tpu.core_type = #tpu.core_type<tc>, window_params = [{pipeline_mode = #tpu.pipeline_mode<synchronous>, transform_indices = @transform_0, window_bounds = array<i64: 32, 65>}, {transform_indices = @transform_1, window_bounds = array<i64: 8, 65, 16>}, {transform_indices = @transform_2, window_bounds = array<i64: 8, 32, 16>}]} {
    %c0 = arith.constant 0 : index
    %c0_0 = arith.constant 0 : index
    %0 = vector.load %arg2[%c0, %c0_0] : memref<32x65xf32, #tpu.memory_space<vmem>>, vector<32x65xf32>
    %c0_1 = arith.constant 0 : index
    %c0_2 = arith.constant 0 : index
    %c0_3 = arith.constant 0 : index
    %1 = vector.load %arg3[%c0_1, %c0_2, %c0_3] : memref<8x65x16xf32, #tpu.memory_space<vmem>>, vector<1x65x16xf32>
    %2 = vector.shape_cast %1 : vector<1x65x16xf32> to vector<65x16xf32>
    %cst = arith.constant dense<0.000000e+00> : vector<32x16xf32>
    %3 = tpu.matmul %0, %2, %cst {dimension_numbers = #tpu.dot_dimension_numbers<[1], [0], [0], [1], [0, 0, 1, 1], [], []>} : vector<32x65xf32>, vector<65x16xf32>, vector<32x16xf32> -> vector<32x16xf32>
    %c0_4 = arith.constant 0 : index
    %c0_5 = arith.constant 0 : index
    %c0_6 = arith.constant 0 : index
    %4 = vector.load %arg4[%c0_4, %c0_5, %c0_6] : memref<8x32x16xf32, #tpu.memory_space<vmem>>, vector<1x32x16xf32>
    %5 = vector.shape_cast %4 : vector<1x32x16xf32> to vector<32x16xf32>
    %6 = vector.shape_cast %3 : vector<32x16xf32> to vector<1x32x16xf32>
    tpu.vector_store %arg4[%c0_4, %c0_5, %c0_6], %6 {strides = array<i32>} : memref<8x32x16xf32, #tpu.memory_space<vmem>>, vector<1x32x16xf32>,
    %c1 = arith.constant 1 : index
    %c0_7 = arith.constant 0 : index
    %c0_8 = arith.constant 0 : index
    %7 = vector.load %arg3[%c1, %c0_7, %c0_8] : memref<8x65x16xf32, #tpu.memory_space<vmem>>, vector<1x65x16xf32>
    %8 = vector.shape_cast %7 : vector<1x65x16xf32> to vector<65x16xf32>
    %cst_9 = arith.constant dense<0.000000e+00> : vector<32x16xf32>
    %9 = tpu.matmul %0, %8, %cst_9 {dimension_numbers = #tpu.dot_dimension_numbers<[1], [0], [0], [1], [0, 0, 1, 1], [], []>} : vector<32x65xf32>, vector<65x16xf32>, vector<32x16xf32> -> vector<32x16xf32>
    %c1_10 = arith.constant 1 : index
    %c0_11 = arith.constant 0 : index
    %c0_12 = arith.constant 0 : index
    %10 = vector.load %arg4[%c1_10, %c0_11, %c0_12] : memref<8x32x16xf32, #tpu.memory_space<vmem>>, vector<1x32x16xf32>
    %11 = vector.shape_cast %10 : vector<1x32x16xf32> to vector<32x16xf32>
    %12 = vector.shape_cast %9 : vector<32x16xf32> to vector<1x32x16xf32>
    tpu.vector_store %arg4[%c1_10, %c0_11, %c0_12], %12 {strides = array<i32>} : memref<8x32x16xf32, #tpu.memory_space<vmem>>, vector<1x32x16xf32>,
    %c2 = arith.constant 2 : index
    %c0_13 = arith.constant 0 : index
    %c0_14 = arith.constant 0 : index
    %13 = vector.load %arg3[%c2, %c0_13, %c0_14] : memref<8x65x16xf32, #tpu.memory_space<vmem>>, vector<1x65x16xf32>
    %14 = vector.shape_cast %13 : vector<1x65x16xf32> to vector<65x16xf32>
    %cst_15 = arith.constant dense<0.000000e+00> : vector<32x16xf32>
    %15 = tpu.matmul %0, %14, %cst_15 {dimension_numbers = #tpu.dot_dimension_numbers<[1], [0], [0], [1], [0, 0, 1, 1], [], []>} : vector<32x65xf32>, vector<65x16xf32>, vector<32x16xf32> -> vector<32x16xf32>
    %c2_16 = arith.constant 2 : index
    %c0_17 = arith.constant 0 : index
    %c0_18 = arith.constant 0 : index
    %16 = vector.load %arg4[%c2_16, %c0_17, %c0_18] : memref<8x32x16xf32, #tpu.memory_space<vmem>>, vector<1x32x16xf32>
    %17 = vector.shape_cast %16 : vector<1x32x16xf32> to vector<32x16xf32>
    %18 = vector.shape_cast %15 : vector<32x16xf32> to vector<1x32x16xf32>
    tpu.vector_store %arg4[%c2_16, %c0_17, %c0_18], %18 {strides = array<i32>} : memref<8x32x16xf32, #tpu.memory_space<vmem>>, vector<1x32x16xf32>,
    %c3 = arith.constant 3 : index
    %c0_19 = arith.constant 0 : index
    %c0_20 = arith.constant 0 : index
    %19 = vector.load %arg3[%c3, %c0_19, %c0_20] : memref<8x65x16xf32, #tpu.memory_space<vmem>>, vector<1x65x16xf32>
    %20 = vector.shape_cast %19 : vector<1x65x16xf32> to vector<65x16xf32>
    %cst_21 = arith.constant dense<0.000000e+00> : vector<32x16xf32>
    %21 = tpu.matmul %0, %20, %cst_21 {dimension_numbers = #tpu.dot_dimension_numbers<[1], [0], [0], [1], [0, 0, 1, 1], [], []>} : vector<32x65xf32>, vector<65x16xf32>, vector<32x16xf32> -> vector<32x16xf32>
    %c3_22 = arith.constant 3 : index
    %c0_23 = arith.constant 0 : index
    %c0_24 = arith.constant 0 : index
    %22 = vector.load %arg4[%c3_22, %c0_23, %c0_24] : memref<8x32x16xf32, #tpu.memory_space<vmem>>, vector<1x32x16xf32>
    %23 = vector.shape_cast %22 : vector<1x32x16xf32> to vector<32x16xf32>
    %24 = vector.shape_cast %21 : vector<32x16xf32> to vector<1x32x16xf32>
    tpu.vector_store %arg4[%c3_22, %c0_23, %c0_24], %24 {strides = array<i32>} : memref<8x32x16xf32, #tpu.memory_space<vmem>>, vector<1x32x16xf32>,
    %c4 = arith.constant 4 : index
    %c0_25 = arith.constant 0 : index
    %c0_26 = arith.constant 0 : index
    %25 = vector.load %arg3[%c4, %c0_25, %c0_26] : memref<8x65x16xf32, #tpu.memory_space<vmem>>, vector<1x65x16xf32>
    %26 = vector.shape_cast %25 : vector<1x65x16xf32> to vector<65x16xf32>
    %cst_27 = arith.constant dense<0.000000e+00> : vector<32x16xf32>
    %27 = tpu.matmul %0, %26, %cst_27 {dimension_numbers = #tpu.dot_dimension_numbers<[1], [0], [0], [1], [0, 0, 1, 1], [], []>} : vector<32x65xf32>, vector<65x16xf32>, vector<32x16xf32> -> vector<32x16xf32>
    %c4_28 = arith.constant 4 : index
    %c0_29 = arith.constant 0 : index
    %c0_30 = arith.constant 0 : index
    %28 = vector.load %arg4[%c4_28, %c0_29, %c0_30] : memref<8x32x16xf32, #tpu.memory_space<vmem>>, vector<1x32x16xf32>
    %29 = vector.shape_cast %28 : vector<1x32x16xf32> to vector<32x16xf32>
    %30 = vector.shape_cast %27 : vector<32x16xf32> to vector<1x32x16xf32>
    tpu.vector_store %arg4[%c4_28, %c0_29, %c0_30], %30 {strides = array<i32>} : memref<8x32x16xf32, #tpu.memory_space<vmem>>, vector<1x32x16xf32>,
    %c5 = arith.constant 5 : index
    %c0_31 = arith.constant 0 : index
    %c0_32 = arith.constant 0 : index
    %31 = vector.load %arg3[%c5, %c0_31, %c0_32] : memref<8x65x16xf32, #tpu.memory_space<vmem>>, vector<1x65x16xf32>
    %32 = vector.shape_cast %31 : vector<1x65x16xf32> to vector<65x16xf32>
    %cst_33 = arith.constant dense<0.000000e+00> : vector<32x16xf32>
    %33 = tpu.matmul %0, %32, %cst_33 {dimension_numbers = #tpu.dot_dimension_numbers<[1], [0], [0], [1], [0, 0, 1, 1], [], []>} : vector<32x65xf32>, vector<65x16xf32>, vector<32x16xf32> -> vector<32x16xf32>
    %c5_34 = arith.constant 5 : index
    %c0_35 = arith.constant 0 : index
    %c0_36 = arith.constant 0 : index
    %34 = vector.load %arg4[%c5_34, %c0_35, %c0_36] : memref<8x32x16xf32, #tpu.memory_space<vmem>>, vector<1x32x16xf32>
    %35 = vector.shape_cast %34 : vector<1x32x16xf32> to vector<32x16xf32>
    %36 = vector.shape_cast %33 : vector<32x16xf32> to vector<1x32x16xf32>
    tpu.vector_store %arg4[%c5_34, %c0_35, %c0_36], %36 {strides = array<i32>} : memref<8x32x16xf32, #tpu.memory_space<vmem>>, vector<1x32x16xf32>,
    %c6 = arith.constant 6 : index
    %c0_37 = arith.constant 0 : index
    %c0_38 = arith.constant 0 : index
    %37 = vector.load %arg3[%c6, %c0_37, %c0_38] : memref<8x65x16xf32, #tpu.memory_space<vmem>>, vector<1x65x16xf32>
    %38 = vector.shape_cast %37 : vector<1x65x16xf32> to vector<65x16xf32>
    %cst_39 = arith.constant dense<0.000000e+00> : vector<32x16xf32>
    %39 = tpu.matmul %0, %38, %cst_39 {dimension_numbers = #tpu.dot_dimension_numbers<[1], [0], [0], [1], [0, 0, 1, 1], [], []>} : vector<32x65xf32>, vector<65x16xf32>, vector<32x16xf32> -> vector<32x16xf32>
    %c6_40 = arith.constant 6 : index
    %c0_41 = arith.constant 0 : index
    %c0_42 = arith.constant 0 : index
    %40 = vector.load %arg4[%c6_40, %c0_41, %c0_42] : memref<8x32x16xf32, #tpu.memory_space<vmem>>, vector<1x32x16xf32>
    %41 = vector.shape_cast %40 : vector<1x32x16xf32> to vector<32x16xf32>
    %42 = vector.shape_cast %39 : vector<32x16xf32> to vector<1x32x16xf32>
    tpu.vector_store %arg4[%c6_40, %c0_41, %c0_42], %42 {strides = array<i32>} : memref<8x32x16xf32, #tpu.memory_space<vmem>>, vector<1x32x16xf32>,
    %c7 = arith.constant 7 : index
    %c0_43 = arith.constant 0 : index
    %c0_44 = arith.constant 0 : index
    %43 = vector.load %arg3[%c7, %c0_43, %c0_44] : memref<8x65x16xf32, #tpu.memory_space<vmem>>, vector<1x65x16xf32>
    %44 = vector.shape_cast %43 : vector<1x65x16xf32> to vector<65x16xf32>
    %cst_45 = arith.constant dense<0.000000e+00> : vector<32x16xf32>
    %45 = tpu.matmul %0, %44, %cst_45 {dimension_numbers = #tpu.dot_dimension_numbers<[1], [0], [0], [1], [0, 0, 1, 1], [], []>} : vector<32x65xf32>, vector<65x16xf32>, vector<32x16xf32> -> vector<32x16xf32>
    %c7_46 = arith.constant 7 : index
    %c0_47 = arith.constant 0 : index
    %c0_48 = arith.constant 0 : index
    %46 = vector.load %arg4[%c7_46, %c0_47, %c0_48] : memref<8x32x16xf32, #tpu.memory_space<vmem>>, vector<1x32x16xf32>
    %47 = vector.shape_cast %46 : vector<1x32x16xf32> to vector<32x16xf32>
    %48 = vector.shape_cast %45 : vector<32x16xf32> to vector<1x32x16xf32>
    tpu.vector_store %arg4[%c7_46, %c0_47, %c0_48], %48 {strides = array<i32>} : memref<8x32x16xf32, #tpu.memory_space<vmem>>, vector<1x32x16xf32>,
    return
  }
  func.func @transform_0(%arg0: i32, %arg1: i32) -> (i32, i32) {
    %c0_i32 = arith.constant 0 : i32
    %c0_i32_0 = arith.constant 0 : i32
    %c0_i32_1 = arith.constant 0 : i32
    return %c0_i32, %c0_i32_0 : i32, i32
  }
  func.func @transform_1(%arg0: i32, %arg1: i32) -> (i32, i32, i32) {
    %c0_i32 = arith.constant 0 : i32
    %c0_i32_0 = arith.constant 0 : i32
    return %arg1, %c0_i32, %arg0 : i32, i32, i32
  }
  func.func @transform_2(%arg0: i32, %arg1: i32) -> (i32, i32, i32) {
    %c0_i32 = arith.constant 0 : i32
    %c0_i32_0 = arith.constant 0 : i32
    return %arg1, %c0_i32, %arg0 : i32, i32, i32
  }
}

</mosaic_0001>

<bundles_post_ra>
// kernel: mel_scale.1
= control target key start
LH: loop header
LB: loop body
LE: loop exit
PB: predicated region body
PF: predicated region fallthrough
CT: control target
= control target key end

     0   :  { %vm37_vm0 = vcmask 1040384   ;;  %vm24_vm1 = vcmask 531456   ;;  %vm126_vm2 = vcmask 130048   ;;  %s1742_s1 = inlined_call_operand.vmem [shape: f32[8,65,16], index: 1, kind: input, shape index: {}]   ;;  %s1743_s0 = inlined_call_operand.vmem [shape: f32[32,65], index: 0, kind: input, shape index: {}]   ;;  %s1744_s2 = inlined_call_operand.vmem [shape: f32[8,32,16], index: 2, kind: output, shape index: {}]  }
   0x1   :  { %v23_v0 = vld [vmem:[%s1742_s1 + $0x40] sm:$0x1]  ;;  %v869_v1 = vld [vmem:[%s1742_s1 + $0x88] sm:$0x1]  ;;  %v22_v2 = vld [vmem:[%s1742_s1 + $0x38] sm:$0xff] }
   0x2   :  { %1091 = vmatprep.subr.msk.mxu0 %vm37_vm0, %v23_v0  ;;  %1115 = vmatprep.subr.msk.mxu1 %vm37_vm0, %v869_v1  ;;  %v868_v3 = vld [vmem:[%s1742_s1 + $0x80] sm:$0xff]  ;;  %v21_v4 = vld [vmem:[%s1742_s1 + $0x30] sm:$0xff]  ;;  %v867_v5 = vld [vmem:[%s1742_s1 + $0x78] sm:$0xff] }
   0x3   :  { %1092 = vmatpush3.msk.msra.mxu0 %vm37_vm0, %v23_v0  ;;  %1116 = vmatpush3.msk.msra.mxu1 %vm37_vm0, %v869_v1  ;;  %v20_v6 = vld [vmem:[%s1742_s1 + $0x28] sm:$0xff]  ;;  %v866_v7 = vld [vmem:[%s1742_s1 + $0x70] sm:$0xff]  ;;  %v19_v8 = vld [vmem:[%s1742_s1 + $0x20] sm:$0xff] }
   0x4   :  { %1093 = vmatprep.subr.mxu0 %v22_v2  ;;  %1117 = vmatprep.subr.mxu1 %v868_v3  ;;  %v865_v9 = vld [vmem:[%s1742_s1 + $0x68] sm:$0xff]  ;;  %v18_v10 = vld [vmem:[%s1742_s1 + $0x18] sm:$0xff]  ;;  %v864_v11 = vld [vmem:[%s1742_s1 + $0x60] sm:$0xff] }
   0x5   :  { %1094 = vmatpush3.msra.mxu0 %v22_v2  ;;  %1118 = vmatpush3.msra.mxu1 %v868_v3  ;;  %v17_v12 = vld [vmem:[%s1742_s1 + $0x10] sm:$0xff]  ;;  %v863_v13 = vld [vmem:[%s1742_s1 + $0x58] sm:$0xff]  ;;  %v16_v14 = vld [vmem:[%s1742_s1 + $0x8] sm:$0xff] }
   0x6   :  { %1095 = vmatprep.subr.mxu0 %v21_v4  ;;  %1119 = vmatprep.subr.mxu1 %v867_v5  ;;  %v862_v15 = vld [vmem:[%s1742_s1 + $0x50] sm:$0xff]  ;;  %v15_v16 = vld [vmem:[%s1742_s1] sm:$0xff]  ;;  %v861_v17 = vld [vmem:[%s1742_s1 + $0x48] sm:$0xff] }
   0x7   :  { %1096 = vmatpush3.msra.mxu0 %v21_v4  ;;  %1120 = vmatpush3.msra.mxu1 %v867_v5  ;;  %v1359_v18 = vld [vmem:[%s1743_s0] sm:$0xff]  ;;  %v1364_v19 = vld [vmem:[%s1743_s0 + $0x8] sm:$0xff]  ;;  %v887_v20 = vld [vmem:[%s1742_s1 + $0xd0] sm:$0x1] }
   0x8   :  { %1097 = vmatprep.subr.mxu0 %v20_v6  ;;  %1121 = vmatprep.subr.mxu1 %v866_v7  ;;  %v905_v21 = vld [vmem:[%s1742_s1 + $0x118] sm:$0x1]  ;;  %v886_v22 = vld [vmem:[%s1742_s1 + $0xc8] sm:$0xff]  ;;  %v904_v23 = vld [vmem:[%s1742_s1 + $0x110] sm:$0xff] }
   0x9   :  { %1098 = vmatpush3.msra.mxu0 %v20_v6  ;;  %1122 = vmatpush3.msra.mxu1 %v866_v7  ;;  %v885_v24 = vld [vmem:[%s1742_s1 + $0xc0] sm:$0xff]  ;;  %v903_v25 = vld [vmem:[%s1742_s1 + $0x108] sm:$0xff]  ;;  %v884_v26 = vld [vmem:[%s1742_s1 + $0xb8] sm:$0xff] }
   0xa   :  { %1099 = vmatprep.subr.mxu0 %v19_v8  ;;  %1123 = vmatprep.subr.mxu1 %v865_v9  ;;  %v902_v27 = vld [vmem:[%s1742_s1 + $0x100] sm:$0xff]  ;;  %v883_v28 = vld [vmem:[%s1742_s1 + $0xb0] sm:$0xff]  ;;  %v901_v29 = vld [vmem:[%s1742_s1 + $0xf8] sm:$0xff] }
   0xb   :  { %1100 = vmatpush3.msra.mxu0 %v19_v8  ;;  %1124 = vmatpush3.msra.mxu1 %v865_v9  ;;  %v882_v30 = vld [vmem:[%s1742_s1 + $0xa8] sm:$0xff]  ;;  %v900_v31 = vld [vmem:[%s1742_s1 + $0xf0] sm:$0xff]  ;;  %v881_v33 = vld [vmem:[%s1742_s1 + $0xa0] sm:$0xff] }
   0xc   :  { %1101 = vmatprep.subr.mxu0 %v18_v10  ;;  %1125 = vmatprep.subr.mxu1 %v864_v11  ;;  %v1417_v32 = vld [vmem:[%s1743_s0 + $0x10] sm:$0xff]  ;;  %v899_v34 = vld [vmem:[%s1742_s1 + $0xe8] sm:$0xff]  ;;  %v1428_v35 = vld [vmem:[%s1743_s0 + $0x18] sm:$0xff] }
   0xd   :  { %1102 = vmatpush3.msra.mxu0 %v18_v10  ;;  %1126 = vmatpush3.msra.mxu1 %v864_v11  ;;  %v880_v36 = vld [vmem:[%s1742_s1 + $0x98] sm:$0xff]  ;;  %v898_v37 = vld [vmem:[%s1742_s1 + $0xe0] sm:$0xff]  ;;  %v879_v38 = vld [vmem:[%s1742_s1 + $0x90] sm:$0xff] }
   0xe   :  { %1103 = vmatprep.subr.mxu0 %v17_v12  ;;  %1127 = vmatprep.subr.mxu1 %v863_v13  ;;  %v897_v39 = vld [vmem:[%s1742_s1 + $0xd8] sm:$0xff]  ;;  %v923_v40 = vld [vmem:[%s1742_s1 + $0x160] sm:$0x1]  ;;  %v941_v41 = vld [vmem:[%s1742_s1 + $0x1a8] sm:$0x1] }
   0xf   :  { %1104 = vmatpush3.msra.mxu0 %v17_v12  ;;  %1128 = vmatpush3.msra.mxu1 %v863_v13  ;;  %v922_v42 = vld [vmem:[%s1742_s1 + $0x158] sm:$0xff]  ;;  %v940_v43 = vld [vmem:[%s1742_s1 + $0x1a0] sm:$0xff]  ;;  %v921_v44 = vld [vmem:[%s1742_s1 + $0x150] sm:$0xff] }
  0x10   :  { %1105 = vmatprep.subr.mxu0 %v16_v14  ;;  %1129 = vmatprep.subr.mxu1 %v862_v15  ;;  %v939_v45 = vld [vmem:[%s1742_s1 + $0x198] sm:$0xff]  ;;  %v920_v46 = vld [vmem:[%s1742_s1 + $0x148] sm:$0xff]  ;;  %v938_v47 = vld [vmem:[%s1742_s1 + $0x190] sm:$0xff] }
  0x11   :  { %1106 = vmatpush3.msra.mxu0 %v16_v14  ;;  %1130 = vmatpush3.msra.mxu1 %v862_v15  ;;  %v919_v48 = vld [vmem:[%s1742_s1 + $0x140] sm:$0xff]  ;;  %v937_v49 = vld [vmem:[%s1742_s1 + $0x188] sm:$0xff]  ;;  %v918_v50 = vld [vmem:[%s1742_s1 + $0x138] sm:$0xff] }
  0x12   :  { %1107 = vmatprep.subr.mxu0 %v15_v16  ;;  %1131 = vmatprep.subr.mxu1 %v861_v17  ;;  %v936_v51 = vld [vmem:[%s1742_s1 + $0x180] sm:$0xff]  ;;  %v917_v52 = vld [vmem:[%s1742_s1 + $0x130] sm:$0xff]  ;;  %v935_v53 = vld [vmem:[%s1742_s1 + $0x178] sm:$0xff] }
  0x13   :  { %1108 = vmatpush3.msra.mxu0 %v15_v16  ;;  %1109 = vmatprep.mubr.msk.f32.mxu0 %vm24_vm1, %v1359_v18  ;;  %v916_v54 = vld [vmem:[%s1742_s1 + $0x128] sm:$0xff]  ;;  %v934_v55 = vld [vmem:[%s1742_s1 + $0x170] sm:$0xff]  ;;  %v915_v56 = vld [vmem:[%s1742_s1 + $0x120] sm:$0xff] }
  0x14   :  { %1132 = vmatpush3.msra.mxu1 %v861_v17  ;;  %1133 = vmatprep.mubr.msk.f32.mxu1 %vm24_vm1, %v1359_v18  ;;  %v933_v57 = vld [vmem:[%s1742_s1 + $0x168] sm:$0xff]  ;;  %v959_v58 = vld [vmem:[%s1742_s1 + $0x1f0] sm:$0x1]  ;;  %v977_v59 = vld [vmem:[%s1742_s1 + $0x238] sm:$0x1] }
  0x15   :  { %1110 = vmatmul.mubr.msk.f32.vlgmr.msra.gmra.mxu0 %vm24_vm1, %v1364_v19  ;;  %1134 = vmatmul.mubr.msk.f32.vlgmr.msra.gmra.mxu1 %vm24_vm1, %v1364_v19  ;;  %v958_v60 = vld [vmem:[%s1742_s1 + $0x1e8] sm:$0xff]  ;;  %v976_v61 = vld [vmem:[%s1742_s1 + $0x230] sm:$0xff]  ;;  %v957_v62 = vld [vmem:[%s1742_s1 + $0x1e0] sm:$0xff] }
  0x16   :  { %1139 = vmatprep.subr.msk.mxu0 %vm37_vm0, %v887_v20  ;;  %1163 = vmatprep.subr.msk.mxu1 %vm37_vm0, %v905_v21  ;;  %v975_v63 = vld [vmem:[%s1742_s1 + $0x228] sm:$0xff]  ;;  %v956_v0 = vld [vmem:[%s1742_s1 + $0x1d8] sm:$0xff]  ;;  %v974_v1 = vld [vmem:[%s1742_s1 + $0x220] sm:$0xff] }
  0x17   :  { %1140 = vmatpush3.msk.msra.mxu0 %vm37_vm0, %v887_v20  ;;  %1164 = vmatpush3.msk.msra.mxu1 %vm37_vm0, %v905_v21  ;;  %v955_v2 = vld [vmem:[%s1742_s1 + $0x1d0] sm:$0xff]  ;;  %v973_v3 = vld [vmem:[%s1742_s1 + $0x218] sm:$0xff]  ;;  %v954_v4 = vld [vmem:[%s1742_s1 + $0x1c8] sm:$0xff] }
  0x18   :  { %1141 = vmatprep.subr.mxu0 %v886_v22  ;;  %1165 = vmatprep.subr.mxu1 %v904_v23  ;;  %v972_v5 = vld [vmem:[%s1742_s1 + $0x210] sm:$0xff]  ;;  %v953_v6 = vld [vmem:[%s1742_s1 + $0x1c0] sm:$0xff]  ;;  %v971_v7 = vld [vmem:[%s1742_s1 + $0x208] sm:$0xff] }
  0x19   :  { %1142 = vmatpush3.msra.mxu0 %v886_v22  ;;  %1166 = vmatpush3.msra.mxu1 %v904_v23  ;;  %v952_v8 = vld [vmem:[%s1742_s1 + $0x1b8] sm:$0xff]  ;;  %v970_v9 = vld [vmem:[%s1742_s1 + $0x200] sm:$0xff]  ;;  %v951_v10 = vld [vmem:[%s1742_s1 + $0x1b0] sm:$0xff] }
  0x1a   :  { %1143 = vmatprep.subr.mxu0 %v885_v24  ;;  %1167 = vmatprep.subr.mxu1 %v903_v25  ;;  %v969_v11 = vld [vmem:[%s1742_s1 + $0x1f8] sm:$0xff] }
  0x1b   :  { %1144 = vmatpush3.msra.mxu0 %v885_v24  ;;  %1168 = vmatpush3.msra.mxu1 %v903_v25 }
  0x1c   :  { %1145 = vmatprep.subr.mxu0 %v884_v26  ;;  %1169 = vmatprep.subr.mxu1 %v902_v27 }
  0x1d   :  { %1146 = vmatpush3.msra.mxu0 %v884_v26  ;;  %1170 = vmatpush3.msra.mxu1 %v902_v27 }
  0x1e   :  { %1147 = vmatprep.subr.mxu0 %v883_v28  ;;  %1171 = vmatprep.subr.mxu1 %v901_v29 }
  0x1f   :  { %1148 = vmatpush3.msra.mxu0 %v883_v28  ;;  %1172 = vmatpush3.msra.mxu1 %v901_v29 }
  0x20   :  { %1149 = vmatprep.subr.mxu0 %v882_v30  ;;  %1173 = vmatprep.subr.mxu1 %v900_v31 }
  0x21   :  { %1150 = vmatpush3.msra.mxu0 %v882_v30  ;;  %1174 = vmatpush3.msra.mxu1 %v900_v31 }
  0x22   :  { %1112 = vmatprep.mubr.msk.f32.mxu0 %vm24_vm1, %v1417_v32  ;;  %1136 = vmatprep.mubr.msk.f32.mxu1 %vm24_vm1, %v1417_v32 }
  0x23   :  { %1151 = vmatprep.subr.mxu0 %v881_v33  ;;  %1175 = vmatprep.subr.mxu1 %v899_v34 }
  0x24   :  { %1113 = vmatmul.mubr.msk.f32.gmra.mxu0 %vm24_vm1, %v1428_v35  ;;  %1137 = vmatmul.mubr.msk.f32.gmra.mxu1 %vm24_vm1, %v1428_v35 }
  0x25   :  { %1152 = vmatpush3.msra.mxu0 %v881_v33  ;;  %1176 = vmatpush3.msra.mxu1 %v899_v34 }
  0x26   :  { %1153 = vmatprep.subr.mxu0 %v880_v36  ;;  %1177 = vmatprep.subr.mxu1 %v898_v37 }
  0x27   :  { %1154 = vmatpush3.msra.mxu0 %v880_v36  ;;  %1178 = vmatpush3.msra.mxu1 %v898_v37 }
  0x28   :  { %1155 = vmatprep.subr.mxu0 %v879_v38  ;;  %1179 = vmatprep.subr.mxu1 %v897_v39 }
  0x29   :  { %1156 = vmatpush3.msra.mxu0 %v879_v38  ;;  %1157 = vmatprep.mubr.msk.f32.mxu0 %vm24_vm1, %v1359_v18 }
  0x2a   :  { %1180 = vmatpush3.msra.mxu1 %v897_v39  ;;  %1181 = vmatprep.mubr.msk.f32.mxu1 %vm24_vm1, %v1359_v18 }
  0x2b   :  { %1158 = vmatmul.mubr.msk.f32.vlgmr.msra.gmra.mxu0 %vm24_vm1, %v1364_v19  ;;  %1182 = vmatmul.mubr.msk.f32.vlgmr.msra.gmra.mxu1 %vm24_vm1, %v1364_v19 }
  0x2c   :  { %1187 = vmatprep.subr.msk.mxu0 %vm37_vm0, %v923_v40  ;;  %1211 = vmatprep.subr.msk.mxu1 %vm37_vm0, %v941_v41 }
  0x2d   :  { %1188 = vmatpush3.msk.msra.mxu0 %vm37_vm0, %v923_v40  ;;  %1212 = vmatpush3.msk.msra.mxu1 %vm37_vm0, %v941_v41 }
  0x2e   :  { %1189 = vmatprep.subr.mxu0 %v922_v42  ;;  %1213 = vmatprep.subr.mxu1 %v940_v43 }
  0x2f   :  { %1190 = vmatpush3.msra.mxu0 %v922_v42  ;;  %1214 = vmatpush3.msra.mxu1 %v940_v43 }
  0x30   :  { %1191 = vmatprep.subr.mxu0 %v921_v44  ;;  %1215 = vmatprep.subr.mxu1 %v939_v45 }
  0x31   :  { %1192 = vmatpush3.msra.mxu0 %v921_v44  ;;  %1216 = vmatpush3.msra.mxu1 %v939_v45 }
  0x32   :  { %1193 = vmatprep.subr.mxu0 %v920_v46  ;;  %1217 = vmatprep.subr.mxu1 %v938_v47 }
  0x33   :  { %1194 = vmatpush3.msra.mxu0 %v920_v46  ;;  %1218 = vmatpush3.msra.mxu1 %v938_v47 }
  0x34   :  { %1195 = vmatprep.subr.mxu0 %v919_v48  ;;  %1219 = vmatprep.subr.mxu1 %v937_v49 }
  0x35   :  { %1196 = vmatpush3.msra.mxu0 %v919_v48  ;;  %1220 = vmatpush3.msra.mxu1 %v937_v49 }
  0x36   :  { %1197 = vmatprep.subr.mxu0 %v918_v50  ;;  %1221 = vmatprep.subr.mxu1 %v936_v51 }
  0x37   :  { %1198 = vmatpush3.msra.mxu0 %v918_v50  ;;  %1222 = vmatpush3.msra.mxu1 %v936_v51 }
  0x38   :  { %1160 = vmatprep.mubr.msk.f32.mxu0 %vm24_vm1, %v1417_v32  ;;  %1184 = vmatprep.mubr.msk.f32.mxu1 %vm24_vm1, %v1417_v32 }
  0x39   :  { %1199 = vmatprep.subr.mxu0 %v917_v52  ;;  %1223 = vmatprep.subr.mxu1 %v935_v53 }
  0x3a   :  { %1161 = vmatmul.mubr.msk.f32.gmra.mxu0 %vm24_vm1, %v1428_v35  ;;  %1185 = vmatmul.mubr.msk.f32.gmra.mxu1 %vm24_vm1, %v1428_v35 }
  0x3b   :  { %1200 = vmatpush3.msra.mxu0 %v917_v52  ;;  %1224 = vmatpush3.msra.mxu1 %v935_v53 }
  0x3c   :  { %1201 = vmatprep.subr.mxu0 %v916_v54  ;;  %1225 = vmatprep.subr.mxu1 %v934_v55 }
  0x3d   :  { %1202 = vmatpush3.msra.mxu0 %v916_v54  ;;  %1226 = vmatpush3.msra.mxu1 %v934_v55 }
  0x3e   :  { %1203 = vmatprep.subr.mxu0 %v915_v56  ;;  %1227 = vmatprep.subr.mxu1 %v933_v57 }
  0x3f   :  { %1204 = vmatpush3.msra.mxu0 %v915_v56  ;;  %1205 = vmatprep.mubr.msk.f32.mxu0 %vm24_vm1, %v1359_v18 }
  0x40   :  { %1228 = vmatpush3.msra.mxu1 %v933_v57  ;;  %1229 = vmatprep.mubr.msk.f32.mxu1 %vm24_vm1, %v1359_v18 }
  0x41   :  { %1206 = vmatmul.mubr.msk.f32.vlgmr.msra.gmra.mxu0 %vm24_vm1, %v1364_v19  ;;  %1230 = vmatmul.mubr.msk.f32.vlgmr.msra.gmra.mxu1 %vm24_vm1, %v1364_v19 }
  0x42   :  { %1235 = vmatprep.subr.msk.mxu0 %vm37_vm0, %v959_v58  ;;  %1259 = vmatprep.subr.msk.mxu1 %vm37_vm0, %v977_v59 }
  0x43   :  { %1236 = vmatpush3.msk.msra.mxu0 %vm37_vm0, %v959_v58  ;;  %1260 = vmatpush3.msk.msra.mxu1 %vm37_vm0, %v977_v59 }
  0x44   :  { %1237 = vmatprep.subr.mxu0 %v958_v60  ;;  %1261 = vmatprep.subr.mxu1 %v976_v61 }
  0x45   :  { %1238 = vmatpush3.msra.mxu0 %v958_v60  ;;  %1262 = vmatpush3.msra.mxu1 %v976_v61 }
  0x46   :  { %1239 = vmatprep.subr.mxu0 %v957_v62  ;;  %1263 = vmatprep.subr.mxu1 %v975_v63 }
  0x47   :  { %1240 = vmatpush3.msra.mxu0 %v957_v62  ;;  %1264 = vmatpush3.msra.mxu1 %v975_v63 }
  0x48   :  { %1241 = vmatprep.subr.mxu0 %v956_v0  ;;  %1265 = vmatprep.subr.mxu1 %v974_v1 }
  0x49   :  { %1242 = vmatpush3.msra.mxu0 %v956_v0  ;;  %1266 = vmatpush3.msra.mxu1 %v974_v1 }
  0x4a   :  { %1243 = vmatprep.subr.mxu0 %v955_v2  ;;  %1267 = vmatprep.subr.mxu1 %v973_v3 }
  0x4b   :  { %1244 = vmatpush3.msra.mxu0 %v955_v2  ;;  %1268 = vmatpush3.msra.mxu1 %v973_v3 }
  0x4c   :  { %1245 = vmatprep.subr.mxu0 %v954_v4  ;;  %1269 = vmatprep.subr.mxu1 %v972_v5 }
  0x4d   :  { %1208 = vmatprep.mubr.msk.f32.mxu0 %vm24_vm1, %v1417_v32  ;;  %1232 = vmatprep.mubr.msk.f32.mxu1 %vm24_vm1, %v1417_v32 }
  0x4e   :  { %1246 = vmatpush3.msra.mxu0 %v954_v4  ;;  %1270 = vmatpush3.msra.mxu1 %v972_v5 }
  0x4f   :  { %1209 = vmatmul.mubr.msk.f32.gmra.mxu0 %vm24_vm1, %v1428_v35  ;;  %1233 = vmatmul.mubr.msk.f32.gmra.mxu1 %vm24_vm1, %v1428_v35 }
  0x50   :  { %1247 = vmatprep.subr.mxu0 %v953_v6  ;;  %1271 = vmatprep.subr.mxu1 %v971_v7 }
  0x51   :  { %1248 = vmatpush3.msra.mxu0 %v953_v6  ;;  %1272 = vmatpush3.msra.mxu1 %v971_v7 }
  0x52   :  { %1249 = vmatprep.subr.mxu0 %v952_v8  ;;  %1273 = vmatprep.subr.mxu1 %v970_v9 }
  0x53   :  { %1250 = vmatpush3.msra.mxu0 %v952_v8  ;;  %1274 = vmatpush3.msra.mxu1 %v970_v9 }
  0x54   :  { %1251 = vmatprep.subr.mxu0 %v951_v10  ;;  %1275 = vmatprep.subr.mxu1 %v969_v11 }
  0x55   :  { %1252 = vmatpush3.msra.mxu0 %v951_v10  ;;  %1253 = vmatprep.mubr.msk.f32.mxu0 %vm24_vm1, %v1359_v18 }
  0x56   :  { %1276 = vmatpush3.msra.mxu1 %v969_v11  ;;  %1277 = vmatprep.mubr.msk.f32.mxu1 %vm24_vm1, %v1359_v18 }
  0x57   :  { %1254 = vmatmul.mubr.msk.f32.vlgmr.msra.gmra.mxu0 %vm24_vm1, %v1364_v19  ;;  %1278 = vmatmul.mubr.msk.f32.vlgmr.msra.gmra.mxu1 %vm24_vm1, %v1364_v19 }
  0x58   :  { %1256 = vmatprep.mubr.msk.f32.mxu0 %vm24_vm1, %v1417_v32  ;;  %1280 = vmatprep.mubr.msk.f32.mxu1 %vm24_vm1, %v1417_v32 }
  0x5b   :  { %1257 = vmatmul.mubr.msk.f32.gmra.mxu0 %vm24_vm1, %v1428_v35  ;;  %1281 = vmatmul.mubr.msk.f32.gmra.mxu1 %vm24_vm1, %v1428_v35 }
  0xd5   :  { %v1111_v12 = vpop.f32.mrf.mxu0  ;;  %v1135_v13 = vpop.f32.mrf.mxu1 }
  0xd6   :  { %128 = vst.msk [vmem:[%s1744_s2 + $0x8] sm:$0xff] %vm126_vm2, %v1111_v12  ;;  %876 = vst.msk [vmem:[%s1744_s2 + $0x28] sm:$0xff] %vm126_vm2, %v1135_v13 }
  0xd7   :  { %v107_v14 = vpop.f32.mrf.mxu0  ;;  %v210_v15 = vpop.f32.mrf.mxu1 }
  0xd8   :  { %127 = vst.msk [vmem:[%s1744_s2] sm:$0xff] %vm126_vm2, %v107_v14  ;;  %875 = vst.msk [vmem:[%s1744_s2 + $0x20] sm:$0xff] %vm126_vm2, %v210_v15 }
  0xe4   :  { %v1114_v16 = vpop.f32.mrf.mxu0  ;;  %v1138_v17 = vpop.f32.mrf.mxu1 }
  0xe5   :  { %130 = vst.msk [vmem:[%s1744_s2 + $0x18] sm:$0xff] %vm126_vm2, %v1114_v16  ;;  %878 = vst.msk [vmem:[%s1744_s2 + $0x38] sm:$0xff] %vm126_vm2, %v1138_v17 }
  0xe6   :  { %v117_v18 = vpop.f32.mrf.mxu0  ;;  %v220_v19 = vpop.f32.mrf.mxu1 }
  0xe7   :  { %129 = vst.msk [vmem:[%s1744_s2 + $0x10] sm:$0xff] %vm126_vm2, %v117_v18  ;;  %877 = vst.msk [vmem:[%s1744_s2 + $0x30] sm:$0xff] %vm126_vm2, %v220_v19 }
  0xeb   :  { %v1159_v20 = vpop.f32.mrf.mxu0  ;;  %v1183_v21 = vpop.f32.mrf.mxu1 }
  0xec   :  { %894 = vst.msk [vmem:[%s1744_s2 + $0x48] sm:$0xff] %vm126_vm2, %v1159_v20  ;;  %912 = vst.msk [vmem:[%s1744_s2 + $0x68] sm:$0xff] %vm126_vm2, %v1183_v21 }
  0xed   :  { %v313_v22 = vpop.f32.mrf.mxu0  ;;  %v416_v23 = vpop.f32.mrf.mxu1 }
  0xee   :  { %893 = vst.msk [vmem:[%s1744_s2 + $0x40] sm:$0xff] %vm126_vm2, %v313_v22  ;;  %911 = vst.msk [vmem:[%s1744_s2 + $0x60] sm:$0xff] %vm126_vm2, %v416_v23 }
  0xfa   :  { %v1162_v24 = vpop.f32.mrf.mxu0  ;;  %v1186_v25 = vpop.f32.mrf.mxu1 }
  0xfb   :  { %896 = vst.msk [vmem:[%s1744_s2 + $0x58] sm:$0xff] %vm126_vm2, %v1162_v24  ;;  %914 = vst.msk [vmem:[%s1744_s2 + $0x78] sm:$0xff] %vm126_vm2, %v1186_v25 }
  0xfc   :  { %v323_v26 = vpop.f32.mrf.mxu0  ;;  %v426_v27 = vpop.f32.mrf.mxu1 }
  0xfd   :  { %895 = vst.msk [vmem:[%s1744_s2 + $0x50] sm:$0xff] %vm126_vm2, %v323_v26  ;;  %913 = vst.msk [vmem:[%s1744_s2 + $0x70] sm:$0xff] %vm126_vm2, %v426_v27 }
 0x101   :  { %v1207_v28 = vpop.f32.mrf.mxu0  ;;  %v1231_v29 = vpop.f32.mrf.mxu1 }
 0x102   :  { %930 = vst.msk [vmem:[%s1744_s2 + $0x88] sm:$0xff] %vm126_vm2, %v1207_v28  ;;  %948 = vst.msk [vmem:[%s1744_s2 + $0xa8] sm:$0xff] %vm126_vm2, %v1231_v29 }
 0x103   :  { %v519_v30 = vpop.f32.mrf.mxu0  ;;  %v622_v31 = vpop.f32.mrf.mxu1 }
 0x104   :  { %929 = vst.msk [vmem:[%s1744_s2 + $0x80] sm:$0xff] %vm126_vm2, %v519_v30  ;;  %947 = vst.msk [vmem:[%s1744_s2 + $0xa0] sm:$0xff] %vm126_vm2, %v622_v31 }
 0x10f   :  { %v1210_v32 = vpop.f32.mrf.mxu0  ;;  %v1234_v33 = vpop.f32.mrf.mxu1 }
 0x110   :  { %932 = vst.msk [vmem:[%s1744_s2 + $0x98] sm:$0xff] %vm126_vm2, %v1210_v32  ;;  %950 = vst.msk [vmem:[%s1744_s2 + $0xb8] sm:$0xff] %vm126_vm2, %v1234_v33 }
 0x111   :  { %v529_v34 = vpop.f32.mrf.mxu0  ;;  %v632_v35 = vpop.f32.mrf.mxu1 }
 0x112   :  { %931 = vst.msk [vmem:[%s1744_s2 + $0x90] sm:$0xff] %vm126_vm2, %v529_v34  ;;  %949 = vst.msk [vmem:[%s1744_s2 + $0xb0] sm:$0xff] %vm126_vm2, %v632_v35 }
 0x117   :  { %v1255_v36 = vpop.f32.mrf.mxu0  ;;  %v1279_v37 = vpop.f32.mrf.mxu1 }
 0x118   :  { %966 = vst.msk [vmem:[%s1744_s2 + $0xc8] sm:$0xff] %vm126_vm2, %v1255_v36  ;;  %984 = vst.msk [vmem:[%s1744_s2 + $0xe8] sm:$0xff] %vm126_vm2, %v1279_v37 }
 0x119   :  { %v725_v38 = vpop.f32.mrf.mxu0  ;;  %v828_v39 = vpop.f32.mrf.mxu1 }
 0x11a   :  { %965 = vst.msk [vmem:[%s1744_s2 + $0xc0] sm:$0xff] %vm126_vm2, %v725_v38  ;;  %983 = vst.msk [vmem:[%s1744_s2 + $0xe0] sm:$0xff] %vm126_vm2, %v828_v39 }
 0x11b   :  { %v1258_v40 = vpop.f32.mrf.mxu0  ;;  %v1282_v41 = vpop.f32.mrf.mxu1 }
 0x11c   :  { %968 = vst.msk [vmem:[%s1744_s2 + $0xd8] sm:$0xff] %vm126_vm2, %v1258_v40  ;;  %986 = vst.msk [vmem:[%s1744_s2 + $0xf8] sm:$0xff] %vm126_vm2, %v1282_v41 }
 0x11d   :  { %v735_v42 = vpop.f32.mrf.mxu0  ;;  %v838_v43 = vpop.f32.mrf.mxu1 }
 0x11e   :  { %967 = vst.msk [vmem:[%s1744_s2 + $0xd0] sm:$0xff] %vm126_vm2, %v735_v42  ;;  %985 = vst.msk [vmem:[%s1744_s2 + $0xf0] sm:$0xff] %vm126_vm2, %v838_v43 }

</bundles_post_ra>
